<compile_context>
chip_gen: v7x
topology: tpu7x:2x2x1
jax: 0.10.0
libtpu: 0.0.40
codegen_flags: <defaults>
</compile_context>

<pallas_src>
import functools

import jax
import jax.numpy as jnp
from jax.experimental import pallas as pl
from jax.experimental.pallas import tpu as pltpu

EPS = 1e-5
MIB = 1024 * 1024


def _round_up(a, b):
    return ((a + b - 1) // b) * b


def _fold_factor(M, C):
    """Lane-densification factor k: view (M, C) as (M//k, k*C) when C << 128."""
    if C >= 128:
        return 1
    k = 1
    while 2 * k * C <= 512 and M % (2 * k) == 0:
        k *= 2
    return k


def _pick_rows(M, bytes_per_row, budget_bytes):
    """Largest row tile fitting a per-kernel VMEM budget (v5e-safe)."""
    cap = (budget_bytes // max(bytes_per_row, 1)) // 8 * 8
    cap = max(256, min(2048, cap))
    if M <= cap:
        return M            # full extent: always a legal block shape
    return cap              # multiple of 8; last block partial + masked


def _vmem_limit(estimate_bytes):
    """Explicit scoped-VMEM limit derived from actual block+scratch sizes."""
    return int(min(100 * MIB, max(32 * MIB, 2 * estimate_bytes)))


# ----------------------------------------------------------------------------
# Kernel 0: fused batch sum / sum-of-squares over x (lane-dense view) ->
# folded BN1 (scale, bias).  Running sums live in VMEM scratch; the (1, Cin)
# outputs are written only at finalize (constant block index -> single flush).
# TODO(synk): v7x megacore split with per-core partials + cross-core reduce.
# ----------------------------------------------------------------------------
def bn_stats_fold_kernel(xf_ref, unfold_ref, gamma_ref, beta_ref,
                         scale_ref, bias_ref, sum_ref, sq_ref, *,
                         n_rows_folded, inv_count, need_mask):
    i = pl.program_id(0)
    tm = xf_ref.shape[0]

    @pl.when(i == 0)
    def _init():
        sum_ref[...] = jnp.zeros_like(sum_ref)   # running sum(x)   (lane-dense)
        sq_ref[...] = jnp.zeros_like(sq_ref)     # running sum(x*x) (lane-dense)

    x = xf_ref[...]
    if need_mask:
        # Partial last block: OOB rows contain garbage -> mask them to 0.
        row = i * tm + jax.lax.broadcasted_iota(jnp.int32, (tm, 1), 0)
        x = jnp.where(row < n_rows_folded, x, 0.0)
    sum_ref[...] += jnp.sum(x, axis=0, keepdims=True)
    sq_ref[...] += jnp.sum(x * x, axis=0, keepdims=True)

    @pl.when(i == pl.num_programs(0) - 1)
    def _finalize():
        # Unfold the lane-dense (1, k*Cin) partials to per-channel (1, Cin)
        # with a tiny one-shot matmul against a one-hot operator.
        s = jnp.dot(sum_ref[...], unfold_ref[...],
                    preferred_element_type=jnp.float32)
        q = jnp.dot(sq_ref[...], unfold_ref[...],
                    preferred_element_type=jnp.float32)
        m = s * inv_count
        v = jnp.maximum(q * inv_count - m * m, 0.0)   # biased var, clamped
        sc = gamma_ref[...] / jnp.sqrt(v + EPS)
        scale_ref[...] = sc
        bias_ref[...] = beta_ref[...] - m * sc


# ----------------------------------------------------------------------------
# Kernel A: fused BN1(folded) -> ReLU -> 1x1 conv (bf16 MXU matmul, f32 acc).
# Also accumulates BN2 batch stats of its own output and emits the folded BN2
# (scale, bias) at finalize.  Resident accumulators -> "arbitrary" grid axis.
# TODO(synk): v7x megacore: split the row axis per-core with partial
#             accumulators and a cross-core reduction epilogue.
# ----------------------------------------------------------------------------
def bn_relu_conv1x1_kernel(x_ref, scale1_ref, bias1_ref, w_ref, gamma2_ref,
                           beta2_ref, h_ref, scale2_ref, bias2_ref, *,
                           n_rows, inv_count, need_mask):
    i = pl.program_id(0)
    tm = x_ref.shape[0]

    a = jnp.maximum(x_ref[...] * scale1_ref[...] + bias1_ref[...], 0.0)
    if need_mask:
        # Mask garbage tail rows so they pollute neither h nor the BN2 stats.
        row = i * tm + jax.lax.broadcasted_iota(jnp.int32, (tm, 1), 0)
        a = jnp.where(row < n_rows, a, 0.0)

    h = jnp.dot(a.astype(jnp.bfloat16), w_ref[...],
                preferred_element_type=jnp.float32)
    h_ref[...] = h.astype(h_ref.dtype)            # bf16 writeback (half HBM)

    @pl.when(i == 0)
    def _init():
        scale2_ref[...] = jnp.zeros_like(scale2_ref)   # running sum(h)
        bias2_ref[...] = jnp.zeros_like(bias2_ref)     # running sum(h*h)

    scale2_ref[...] += jnp.sum(h, axis=0, keepdims=True)
    bias2_ref[...] += jnp.sum(h * h, axis=0, keepdims=True)

    @pl.when(i == pl.num_programs(0) - 1)
    def _finalize():
        m = scale2_ref[...] * inv_count
        v = jnp.maximum(bias2_ref[...] * inv_count - m * m, 0.0)
        s = gamma2_ref[...] / jnp.sqrt(v + EPS)
        scale2_ref[...] = s
        bias2_ref[...] = beta2_ref[...] - m * s


# ----------------------------------------------------------------------------
# Kernel B: per-image  BN2(folded) -> ReLU -> 3x3 conv (padding=1) -> concat
# with x.  No im2col slab: nine accumulating (H*W, C) x (C, G) bf16 matmuls
# into a small f32 VMEM accumulator.  Gridded over N, "parallel".
# TODO(synk): for very large spatial sizes (v7x 64 MiB VMEM) tile H with a
#             1-row halo instead of whole-image blocks.
# ----------------------------------------------------------------------------
def bn_relu_conv3x3_concat_kernel(x_ref, h_ref, scale_ref, bias_ref, w_ref,
                                  out_ref, pad_ref, acc_ref):
    _, H, W, C = h_ref.shape
    Cin = x_ref.shape[-1]
    G = w_ref.shape[-1]

    scale = scale_ref[...].reshape(1, 1, 1, C)
    bias = bias_ref[...].reshape(1, 1, 1, C)
    a = jnp.maximum(h_ref[...].astype(jnp.float32) * scale + bias, 0.0)

    # Zero only the 1-element halo.  Done every step (not just program_id==0):
    # scratch is per-TensorCore and with a "parallel" axis a core may never
    # execute step 0; the border costs ~2(H+W) rows vs a full (H+2)(W+2) pass.
    zrow = jnp.zeros((1, 1, W + 2, C), pad_ref.dtype)
    zcol = jnp.zeros((1, H + 2, 1, C), pad_ref.dtype)
    pad_ref[:, 0:1, :, :] = zrow
    pad_ref[:, H + 1:H + 2, :, :] = zrow
    pad_ref[:, :, 0:1, :] = zcol
    pad_ref[:, :, W + 1:W + 2, :] = zcol
    pad_ref[:, 1:1 + H, 1:1 + W, :] = a

    # 3x3 conv as nine accumulating MXU matmuls (bf16 operands, f32 acc) into
    # a tiny (H*W, G) VMEM accumulator -- the im2col slab and its extra
    # activation-sized VMEM copy passes are gone.
    for j in range(9):
        kh, kw = j // 3, j % 3
        tap = pad_ref[:, kh:kh + H, kw:kw + W, :].reshape(H * W, C)
        d = jnp.dot(tap.astype(jnp.bfloat16), w_ref[j * C:(j + 1) * C, :],
                    preferred_element_type=jnp.float32)
        if j == 0:
            acc_ref[...] = d
        else:
            acc_ref[...] += d

    # Fused channel concat via two direct sub-slice stores (no lane concat op,
    # no extra HBM pass for an XLA concatenate).
    out_ref[:, :, :, :Cin] = x_ref[...]
    out_ref[:, :, :, Cin:] = acc_ref[...].reshape(1, H, W, G).astype(out_ref.dtype)


# ----------------------------------------------------------------------------
# Wrapper
# ----------------------------------------------------------------------------
def bottleneck_forward(x_nchw, params):
    N, Cin, H, W = x_nchw.shape
    # TODO(synk): if the surrounding model is NHWC, drop these two transposes
    # (each is a full HBM pass over the largest tensors).
    x = jnp.transpose(x_nchw, (0, 2, 3, 1)).astype(jnp.float32)        # NHWC

    # conv1 weight (Cmid, Cin, 1, 1) -> (Cin, Cmid), bf16 MXU operand.
    w1 = params["w1_t"][:, :, 0, 0].T.astype(jnp.bfloat16)
    Cmid = w1.shape[1]
    # conv2 weight (G, Cmid, 3, 3) -> (9*Cmid, G), rows ordered (kh, kw, c).
    w2 = jnp.transpose(params["w2_t"], (2, 3, 1, 0)).reshape(9 * Cmid, -1)
    w2 = w2.astype(jnp.bfloat16)
    G = w2.shape[-1]

    gamma1 = params["gamma1"].reshape(1, Cin).astype(jnp.float32)
    beta1 = params["beta1"].reshape(1, Cin).astype(jnp.float32)
    gamma2 = params["gamma2"].reshape(1, Cmid).astype(jnp.float32)
    beta2 = params["beta2"].reshape(1, Cmid).astype(jnp.float32)

    M = N * H * W
    x2d = x.reshape(M, Cin)                      # contiguous reshape: free

    # --- Kernel 0: BN1 stats + fold (one lane-dense pass over x) ----------
    kf = _fold_factor(M, Cin)
    Ck = kf * Cin
    Mk = M // kf
    xf = x2d.reshape(Mk, Ck)                     # contiguous reshape: free
    # (Ck, Cin) one-hot "unfold" operator: lane-dense partial sums -> channel.
    unfold = (jnp.arange(Ck)[:, None] % Cin ==
              jnp.arange(Cin)[None, :]).astype(jnp.float32)

    tm0 = _pick_rows(Mk, 2 * 4 * Ck, 8 * MIB)
    grid0 = pl.cdiv(Mk, tm0)
    est0 = 2 * tm0 * Ck * 4 + Ck * Cin * 4 + 8 * Ck * 4

    scale1, bias1 = pl.pallas_call(
        functools.partial(bn_stats_fold_kernel, n_rows_folded=Mk,
                          inv_count=1.0 / M, need_mask=(Mk % tm0) != 0),
        out_shape=(jax.ShapeDtypeStruct((1, Cin), jnp.float32),
                   jax.ShapeDtypeStruct((1, Cin), jnp.float32)),
        grid=(grid0,),
        in_specs=[pl.BlockSpec((tm0, Ck), lambda i: (i, 0)),
                  pl.BlockSpec((Ck, Cin), lambda i: (0, 0)),
                  pl.BlockSpec((1, Cin), lambda i: (0, 0)),
                  pl.BlockSpec((1, Cin), lambda i: (0, 0))],
        out_specs=(pl.BlockSpec((1, Cin), lambda i: (0, 0)),
                   pl.BlockSpec((1, Cin), lambda i: (0, 0))),
        scratch_shapes=[pltpu.VMEM((1, Ck), jnp.float32),
                        pltpu.VMEM((1, Ck), jnp.float32)],
        compiler_params=pltpu.CompilerParams(
            dimension_semantics=("arbitrary",),
            vmem_limit_bytes=_vmem_limit(est0)),
    )(xf, unfold, gamma1, beta1)

    # --- Kernel A: BN1 -> ReLU -> conv1x1 (bf16 MXU), BN2 stats + fold -----
    tma = _pick_rows(M, 2 * 4 * Cin + 2 * 2 * Cmid, 10 * MIB)
    grida = pl.cdiv(M, tma)
    esta = (2 * tma * Cin * 4 + 2 * tma * Cmid * 2 + Cin * Cmid * 2
            + 8 * (Cin + Cmid) * 4)

    h2d, scale2, bias2 = pl.pallas_call(
        functools.partial(bn_relu_conv1x1_kernel, n_rows=M, inv_count=1.0 / M,
                          need_mask=(M % tma) != 0),
        out_shape=(jax.ShapeDtypeStruct((M, Cmid), jnp.bfloat16),
                   jax.ShapeDtypeStruct((1, Cmid), jnp.float32),
                   jax.ShapeDtypeStruct((1, Cmid), jnp.float32)),
        grid=(grida,),
        in_specs=[pl.BlockSpec((tma, Cin), lambda i: (i, 0)),
                  pl.BlockSpec((1, Cin), lambda i: (0, 0)),
                  pl.BlockSpec((1, Cin), lambda i: (0, 0)),
                  pl.BlockSpec((Cin, Cmid), lambda i: (0, 0)),
                  pl.BlockSpec((1, Cmid), lambda i: (0, 0)),
                  pl.BlockSpec((1, Cmid), lambda i: (0, 0))],
        out_specs=(pl.BlockSpec((tma, Cmid), lambda i: (i, 0)),
                   pl.BlockSpec((1, Cmid), lambda i: (0, 0)),
                   pl.BlockSpec((1, Cmid), lambda i: (0, 0))),
        compiler_params=pltpu.CompilerParams(
            dimension_semantics=("arbitrary",),
            vmem_limit_bytes=_vmem_limit(esta)),
    )(x2d, scale1, bias1, w1, gamma2, beta2)

    h4d = h2d.reshape(N, H, W, Cmid)             # contiguous reshape: free

    # --- Kernel B: BN2 -> ReLU -> conv3x3 -> concat(x, .) ------------------
    # TODO(synk): when M*Cmid fits the per-generation VMEM budget, keep h
    # resident in VMEM (fuse KA and KB with a phase grid axis) and skip the
    # h HBM round trip entirely.
    estb = (2 * H * W * (Cin * 4 + Cmid * 2 + (Cin + G) * 4)
            + (H + 2) * (W + 2) * Cmid * 4 + H * W * G * 4
            + 2 * 9 * Cmid * G * 2)
    out_nhwc = pl.pallas_call(
        bn_relu_conv3x3_concat_kernel,
        out_shape=jax.ShapeDtypeStruct((N, H, W, Cin + G), jnp.float32),
        grid=(N,),
        in_specs=[pl.BlockSpec((1, H, W, Cin), lambda n: (n, 0, 0, 0)),
                  pl.BlockSpec((1, H, W, Cmid), lambda n: (n, 0, 0, 0)),
                  pl.BlockSpec((1, Cmid), lambda n: (0, 0)),
                  pl.BlockSpec((1, Cmid), lambda n: (0, 0)),
                  pl.BlockSpec((9 * Cmid, G), lambda n: (0, 0))],
        out_specs=pl.BlockSpec((1, H, W, Cin + G), lambda n: (n, 0, 0, 0)),
        scratch_shapes=[pltpu.VMEM((1, H + 2, W + 2, Cmid), jnp.float32),
                        pltpu.VMEM((H * W, G), jnp.float32)],
        compiler_params=pltpu.CompilerParams(
            dimension_semantics=("parallel",),
            vmem_limit_bytes=_vmem_limit(estb)),
    )(x, h4d, scale2, bias2, w2)

    return jnp.transpose(out_nhwc, (0, 3, 1, 2))                        # NCHW


# ----------------------------------------------------------------------------
# Pure-JAX reference (mirrors the PyTorch module in NCHW, training-mode BN)
# ----------------------------------------------------------------------------
def ref_forward(x, params):
    m1 = jnp.mean(x, axis=(0, 2, 3), keepdims=True)
    v1 = jnp.mean((x - m1) ** 2, axis=(0, 2, 3), keepdims=True)
    a1 = jax.nn.relu((x - m1) / jnp.sqrt(v1 + EPS)
                     * params["gamma1"][None, :, None, None]
                     + params["beta1"][None, :, None, None])
    h = jax.lax.conv_general_dilated(a1, params["w1_t"], (1, 1), "VALID",
                                     dimension_numbers=("NCHW", "OIHW", "NCHW"))
    m2 = jnp.mean(h, axis=(0, 2, 3), keepdims=True)
    v2 = jnp.mean((h - m2) ** 2, axis=(0, 2, 3), keepdims=True)
    a2 = jax.nn.relu((h - m2) / jnp.sqrt(v2 + EPS)
                     * params["gamma2"][None, :, None, None]
                     + params["beta2"][None, :, None, None])
    out = jax.lax.conv_general_dilated(a2, params["w2_t"], (1, 1), "SAME",
                                       dimension_numbers=("NCHW", "OIHW", "NCHW"))
    return jnp.concatenate([x, out], axis=1)


if __name__ == "__main__":
    nChannels, growthRate = 4, 4
    interChannels = 4 * growthRate
    N, H, W = 2, 16, 16

    key = jax.random.PRNGKey(0)
    k = jax.random.split(key, 7)
    params = {
        "gamma1": 1.0 + 0.1 * jax.random.normal(k[0], (nChannels,), jnp.float32),
        "beta1": 0.1 * jax.random.normal(k[1], (nChannels,), jnp.float32),
        "w1_t": 0.2 * jax.random.normal(k[2], (interChannels, nChannels, 1, 1), jnp.float32),
        "gamma2": 1.0 + 0.1 * jax.random.normal(k[3], (interChannels,), jnp.float32),
        "beta2": 0.1 * jax.random.normal(k[4], (interChannels,), jnp.float32),
        "w2_t": 0.2 * jax.random.normal(k[5], (growthRate, interChannels, 3, 3), jnp.float32),
    }
    x = jax.random.normal(k[6], (N, nChannels, H, W), jnp.float32)

    out = jax.block_until_ready(bottleneck_forward(x, params))
    ref = ref_forward(x, params)

    assert out.shape == (N, nChannels + growthRate, H, W), out.shape
    # Tolerance sized for bf16 MXU operands (f32 accumulation, f32 BN math);
    # the reference is pure f32.
    max_err = float(jnp.max(jnp.abs(out - ref)))
    if not bool(jnp.allclose(out, ref, atol=5e-2, rtol=5e-2)):
        raise AssertionError(f"kernel/ref mismatch, max abs err = {max_err}")
    print("KERNEL_OK")
</pallas_src>

<mosaic_0001>
module attributes {stable_mosaic.version = 11 : i64} {
  func.func @bn_stats_fold_kernel(%arg0: i32, %arg1: memref<4x512xf32, #tpu.memory_space<vmem>>, %arg2: memref<512x4xf32, #tpu.memory_space<vmem>>, %arg3: memref<1x4xf32, #tpu.memory_space<vmem>>, %arg4: memref<1x4xf32, #tpu.memory_space<vmem>>, %arg5: memref<1x4xf32, #tpu.memory_space<vmem>>, %arg6: memref<1x4xf32, #tpu.memory_space<vmem>>, %arg7: memref<1x512xf32, #tpu.memory_space<vmem>>, %arg8: memref<1x512xf32, #tpu.memory_space<vmem>>) attributes {dimension_semantics = [#tpu.dimension_semantics<arbitrary>], iteration_bounds = array<i64: 1>, scalar_prefetch = 0 : i64, scratch_operands = 2 : i64, tpu.core_type = #tpu.core_type<tc>, window_params = [{transform_indices = @transform_0, window_bounds = array<i64: 4, 512>}, {pipeline_mode = #tpu.pipeline_mode<synchronous>, transform_indices = @transform_1, window_bounds = array<i64: 512, 4>}, {pipeline_mode = #tpu.pipeline_mode<synchronous>, transform_indices = @transform_2, window_bounds = array<i64: 1, 4>}, {pipeline_mode = #tpu.pipeline_mode<synchronous>, transform_indices = @transform_3, window_bounds = array<i64: 1, 4>}, {pipeline_mode = #tpu.pipeline_mode<synchronous>, transform_indices = @transform_4, window_bounds = array<i64: 1, 4>}, {pipeline_mode = #tpu.pipeline_mode<synchronous>, transform_indices = @transform_5, window_bounds = array<i64: 1, 4>}]} {
    %c0_i32 = arith.constant 0 : i32
    %0 = arith.cmpi eq, %arg0, %c0_i32 : i32
    %1 = arith.extui %0 : i1 to i32
    %c0_i32_0 = arith.constant 0 : i32
    %2 = arith.cmpi ne, %1, %c0_i32_0 : i32
    scf.if %2 {
      %cst_13 = arith.constant 0.000000e+00 : f32
      %18 = vector.broadcast %cst_13 : f32 to vector<1x512xf32>
      %c0_14 = arith.constant 0 : index
      %c0_15 = arith.constant 0 : index
      %19 = vector.load %arg7[%c0_14, %c0_15] : memref<1x512xf32, #tpu.memory_space<vmem>>, vector<1x512xf32>
      tpu.vector_store %arg7[%c0_14, %c0_15], %18 {strides = array<i32>} : memref<1x512xf32, #tpu.memory_space<vmem>>, vector<1x512xf32>,
      %cst_16 = arith.constant 0.000000e+00 : f32
      %20 = vector.broadcast %cst_16 : f32 to vector<1x512xf32>
      %c0_17 = arith.constant 0 : index
      %c0_18 = arith.constant 0 : index
      %21 = vector.load %arg8[%c0_17, %c0_18] : memref<1x512xf32, #tpu.memory_space<vmem>>, vector<1x512xf32>
      tpu.vector_store %arg8[%c0_17, %c0_18], %20 {strides = array<i32>} : memref<1x512xf32, #tpu.memory_space<vmem>>, vector<1x512xf32>,
    } else {
    }
    %c0 = arith.constant 0 : index
    %c0_1 = arith.constant 0 : index
    %3 = vector.load %arg1[%c0, %c0_1] : memref<4x512xf32, #tpu.memory_space<vmem>>, vector<4x512xf32>
    %c0_2 = arith.constant 0 : index
    %c0_3 = arith.constant 0 : index
    %4 = vector.load %arg7[%c0_2, %c0_3] : memref<1x512xf32, #tpu.memory_space<vmem>>, vector<1x512xf32>
    %cst = arith.constant dense<0.000000e+00> : vector<512xf32>
    %5 = vector.multi_reduction <add>, %3, %cst [0] : vector<4x512xf32> to vector<512xf32>
    %6 = vector.shape_cast %5 : vector<512xf32> to vector<1x512xf32>
    %7 = arith.addf %4, %6 : vector<1x512xf32>
    %c0_4 = arith.constant 0 : index
    %c0_5 = arith.constant 0 : index
    %8 = vector.load %arg7[%c0_4, %c0_5] : memref<1x512xf32, #tpu.memory_space<vmem>>, vector<1x512xf32>
    tpu.vector_store %arg7[%c0_4, %c0_5], %7 {strides = array<i32>} : memref<1x512xf32, #tpu.memory_space<vmem>>, vector<1x512xf32>,
    %c0_6 = arith.constant 0 : index
    %c0_7 = arith.constant 0 : index
    %9 = vector.load %arg8[%c0_6, %c0_7] : memref<1x512xf32, #tpu.memory_space<vmem>>, vector<1x512xf32>
    %10 = arith.mulf %3, %3 : vector<4x512xf32>
    %cst_8 = arith.constant dense<0.000000e+00> : vector<512xf32>
    %11 = vector.multi_reduction <add>, %10, %cst_8 [0] : vector<4x512xf32> to vector<512xf32>
    %12 = vector.shape_cast %11 : vector<512xf32> to vector<1x512xf32>
    %13 = arith.addf %9, %12 : vector<1x512xf32>
    %c0_9 = arith.constant 0 : index
    %c0_10 = arith.constant 0 : index
    %14 = vector.load %arg8[%c0_9, %c0_10] : memref<1x512xf32, #tpu.memory_space<vmem>>, vector<1x512xf32>
    tpu.vector_store %arg8[%c0_9, %c0_10], %13 {strides = array<i32>} : memref<1x512xf32, #tpu.memory_space<vmem>>, vector<1x512xf32>,
    %c0_i32_11 = arith.constant 0 : i32
    %15 = arith.cmpi eq, %arg0, %c0_i32_11 : i32
    %16 = arith.extui %15 : i1 to i32
    %c0_i32_12 = arith.constant 0 : i32
    %17 = arith.cmpi ne, %16, %c0_i32_12 : i32
    scf.if %17 {
      %c0_13 = arith.constant 0 : index
      %c0_14 = arith.constant 0 : index
      %18 = vector.load %arg7[%c0_13, %c0_14] : memref<1x512xf32, #tpu.memory_space<vmem>>, vector<1x512xf32>
      %c0_15 = arith.constant 0 : index
      %c0_16 = arith.constant 0 : index
      %19 = vector.load %arg2[%c0_15, %c0_16] : memref<512x4xf32, #tpu.memory_space<vmem>>, vector<512x4xf32>
      %cst_17 = arith.constant dense<0.000000e+00> : vector<1x4xf32>
      %20 = tpu.matmul %18, %19, %cst_17 {dimension_numbers = #tpu.dot_dimension_numbers<[1], [0], [0], [1], [0, 0, 1, 1], [], []>} : vector<1x512xf32>, vector<512x4xf32>, vector<1x4xf32> -> vector<1x4xf32>
      %c0_18 = arith.constant 0 : index
      %c0_19 = arith.constant 0 : index
      %21 = vector.load %arg8[%c0_18, %c0_19] : memref<1x512xf32, #tpu.memory_space<vmem>>, vector<1x512xf32>
      %c0_20 = arith.constant 0 : index
      %c0_21 = arith.constant 0 : index
      %22 = vector.load %arg2[%c0_20, %c0_21] : memref<512x4xf32, #tpu.memory_space<vmem>>, vector<512x4xf32>
      %cst_22 = arith.constant dense<0.000000e+00> : vector<1x4xf32>
      %23 = tpu.matmul %21, %22, %cst_22 {dimension_numbers = #tpu.dot_dimension_numbers<[1], [0], [0], [1], [0, 0, 1, 1], [], []>} : vector<1x512xf32>, vector<512x4xf32>, vector<1x4xf32> -> vector<1x4xf32>
      %cst_23 = arith.constant 0.001953125 : f32
      %24 = vector.broadcast %cst_23 : f32 to vector<1x4xf32>
      %25 = arith.mulf %20, %24 : vector<1x4xf32>
      %cst_24 = arith.constant 0.001953125 : f32
      %26 = vector.broadcast %cst_24 : f32 to vector<1x4xf32>
      %27 = arith.mulf %23, %26 : vector<1x4xf32>
      %28 = arith.mulf %25, %25 : vector<1x4xf32>
      %29 = arith.subf %27, %28 : vector<1x4xf32>
      %cst_25 = arith.constant 0.000000e+00 : f32
      %30 = vector.broadcast %cst_25 : f32 to vector<1x4xf32>
      %31 = arith.maximumf %29, %30 : vector<1x4xf32>
      %c0_26 = arith.constant 0 : index
      %c0_27 = arith.constant 0 : index
      %32 = vector.load %arg3[%c0_26, %c0_27] : memref<1x4xf32, #tpu.memory_space<vmem>>, vector<1x4xf32>
      %cst_28 = arith.constant 9.99999974E-6 : f32
      %33 = vector.broadcast %cst_28 : f32 to vector<1x4xf32>
      %34 = arith.addf %31, %33 : vector<1x4xf32>
      %35 = math.sqrt %34 : vector<1x4xf32>
      %36 = arith.divf %32, %35 : vector<1x4xf32>
      %c0_29 = arith.constant 0 : index
      %c0_30 = arith.constant 0 : index
      %37 = vector.load %arg5[%c0_29, %c0_30] : memref<1x4xf32, #tpu.memory_space<vmem>>, vector<1x4xf32>
      tpu.vector_store %arg5[%c0_29, %c0_30], %36 {strides = array<i32>} : memref<1x4xf32, #tpu.memory_space<vmem>>, vector<1x4xf32>,
      %c0_31 = arith.constant 0 : index
      %c0_32 = arith.constant 0 : index
      %38 = vector.load %arg4[%c0_31, %c0_32] : memref<1x4xf32, #tpu.memory_space<vmem>>, vector<1x4xf32>
      %39 = arith.mulf %25, %36 : vector<1x4xf32>
      %40 = arith.subf %38, %39 : vector<1x4xf32>
      %c0_33 = arith.constant 0 : index
      %c0_34 = arith.constant 0 : index
      %41 = vector.load %arg6[%c0_33, %c0_34] : memref<1x4xf32, #tpu.memory_space<vmem>>, vector<1x4xf32>
      tpu.vector_store %arg6[%c0_33, %c0_34], %40 {strides = array<i32>} : memref<1x4xf32, #tpu.memory_space<vmem>>, vector<1x4xf32>,
    } else {
    }
    return
  }
  func.func @transform_0(%arg0: i32) -> (i32, i32) {
    %c0_i32 = arith.constant 0 : i32
    %c0_i32_0 = arith.constant 0 : i32
    return %arg0, %c0_i32 : i32, i32
  }
  func.func @transform_1(%arg0: i32) -> (i32, i32) {
    %c0_i32 = arith.constant 0 : i32
    %c0_i32_0 = arith.constant 0 : i32
    %c0_i32_1 = arith.constant 0 : i32
    return %c0_i32, %c0_i32_0 : i32, i32
  }
  func.func @transform_2(%arg0: i32) -> (i32, i32) {
    %c0_i32 = arith.constant 0 : i32
    %c0_i32_0 = arith.constant 0 : i32
    %c0_i32_1 = arith.constant 0 : i32
    return %c0_i32, %c0_i32_0 : i32, i32
  }
  func.func @transform_3(%arg0: i32) -> (i32, i32) {
    %c0_i32 = arith.constant 0 : i32
    %c0_i32_0 = arith.constant 0 : i32
    %c0_i32_1 = arith.constant 0 : i32
    return %c0_i32, %c0_i32_0 : i32, i32
  }
  func.func @transform_4(%arg0: i32) -> (i32, i32) {
    %c0_i32 = arith.constant 0 : i32
    %c0_i32_0 = arith.constant 0 : i32
    %c0_i32_1 = arith.constant 0 : i32
    return %c0_i32, %c0_i32_0 : i32, i32
  }
  func.func @transform_5(%arg0: i32) -> (i32, i32) {
    %c0_i32 = arith.constant 0 : i32
    %c0_i32_0 = arith.constant 0 : i32
    %c0_i32_1 = arith.constant 0 : i32
    return %c0_i32, %c0_i32_0 : i32, i32
  }
}

</mosaic_0001>

<bundles_post_ra>
// kernel: tpu_custom_call.1
= control target key start
LH: loop header
LB: loop body
LE: loop exit
PB: predicated region body
PF: predicated region fallthrough
CT: control target
= control target key end

     0   :  { %11 = vsyncpa [#allocation5], 0  ;;  %v25_v3 = vlaneseq  ;;  %v939_v18 = vmov 0.0   ;;  %vm40_vm1 = vcmask 1043456   ;;  %s1365_s0 = inlined_call_operand.vmem [shape: f32[4,512], index: 0, kind: input, shape index: {}]   ;;  %s1366_s1 = inlined_call_operand.vmem [shape: f32[512,4], index: 1, kind: input, shape index: {}]   ;;  %s1367_s2 = inlined_call_operand.vmem [shape: f32[1,4], index: 2, kind: input, shape index: {}]   ;;  %s1368_s3 = inlined_call_operand.vmem [shape: f32[1,4], index: 3, kind: input, shape index: {}]   ;;  %s1369_s4 = inlined_call_operand.hbm [shape: f32[1,4], index: 4, kind: output, shape index: {0}]   ;;  %s1370_s5 = inlined_call_operand.hbm [shape: f32[1,4], index: 5, kind: output, shape index: {1}]  }
   0x1   :  { %v192_v0 = vld [vmem:[%s1366_s1 + $0x80] sm:$0xff]  ;;  %v193_v1 = vld [vmem:[%s1366_s1 + $0x88] sm:$0xff]  ;;  %v194_v12 = vld [vmem:[%s1366_s1 + $0x90] sm:$0xff] }
   0x2   :  { %v224_v2 = vld [vmem:[%s1366_s1 + $0x180] sm:$0xff]  ;;  %v982_v4 = vpack.c.bf16 %v193_v1, %v192_v0  ;;  %v225_v5 = vld [vmem:[%s1366_s1 + $0x188] sm:$0xff]  ;;  %vm1007_vm0 = vcmp.lt.s32.totalorder %v25_v3, 512  ;;  %v195_v15 = vld [vmem:[%s1366_s1 + $0x98] sm:$0xff] }
   0x3   :  { %v176_v6 = vld [vmem:[%s1366_s1] sm:$0xff]  ;;  %v177_v7 = vld [vmem:[%s1366_s1 + $0x8] sm:$0xff]  ;;  %v993_v8 = vpack.c.bf16 %v225_v5, %v224_v2  ;;  %v226_v16 = vld [vmem:[%s1366_s1 + $0x190] sm:$0xff]  ;;  %29 = vst.msk [vmem:[#allocation2] sm:$0xf] %vm1007_vm0, %v939_v18  ;;  %v1029_v19 = vpack.c.bf16 %v195_v15, %v194_v12 }
   0x4   :  { %v995_v9 = vpack.c.bf16 %v177_v7, %v176_v6  ;;  %v208_v10 = vld [vmem:[%s1366_s1 + $0x100] sm:$0xff]  ;;  %v209_v11 = vld [vmem:[%s1366_s1 + $0x108] sm:$0xff]  ;;  %754 = vmatprep.subr.bf16.mxu0 %v982_v4  ;;  %v227_v17 = vld [vmem:[%s1366_s1 + $0x198] sm:$0xff]  ;;  %30 = vst.msk [vmem:[#allocation3] sm:$0xf] %vm1007_vm0, %v939_v18 }
   0x5   :  { %v1012_v14 = vpack.c.bf16 %v209_v11, %v208_v10  ;;  %786 = vmatprep.subr.bf16.mxu1 %v993_v8  ;;  %v1031_v20 = vpack.c.bf16 %v227_v17, %v226_v16  ;;  %v178_v21 = vld [vmem:[%s1366_s1 + $0x10] sm:$0xff]  ;;  %v179_v22 = vld [vmem:[%s1366_s1 + $0x18] sm:$0xff]  ;;  %v196_v26 = vld [vmem:[%s1366_s1 + $0xa0] sm:$0xff] }
   0x6   :  { %756 = vmatpush3.bf16.msra.mxu0 %v995_v9  ;;  %v210_v23 = vld [vmem:[%s1366_s1 + $0x110] sm:$0xff]  ;;  %v1043_v24 = vpack.c.bf16 %v179_v22, %v178_v21  ;;  %v211_v25 = vld [vmem:[%s1366_s1 + $0x118] sm:$0xff]  ;;  %v197_v27 = vld [vmem:[%s1366_s1 + $0xa8] sm:$0xff]  ;;  %v940_v22 = vmov 1966171168  }
   0x7   :  { %788 = vmatpush3.bf16.msra.mxu1 %v1012_v14  ;;  %758 = vmatprep.subr.bf16.mxu0 %v1029_v19  ;;  %v1056_v28 = vpack.c.bf16 %v211_v25, %v210_v23  ;;  %v1058_v29 = vpack.c.bf16 %v197_v27, %v196_v26  ;;  %v228_v30 = vld [vmem:[%s1366_s1 + $0x1a0] sm:$0xff]  ;;  %v229_v31 = vld [vmem:[%s1366_s1 + $0x1a8] sm:$0xff]  ;;  %v198_v38 = vld [vmem:[%s1366_s1 + $0xb0] sm:$0xff]  ;;  %v1203_v23 = vunpack.c.l.s4 %v940_v22 }
   0x8   :  { %790 = vmatprep.subr.bf16.mxu1 %v1031_v20  ;;  %v180_v32 = vld [vmem:[%s1366_s1 + $0x20] sm:$0xff]  ;;  %v1069_v33 = vpack.c.bf16 %v229_v31, %v228_v30  ;;  %v181_v34 = vld [vmem:[%s1366_s1 + $0x28] sm:$0xff]  ;;  %v199_v39 = vld [vmem:[%s1366_s1 + $0xb8] sm:$0xff] }
   0x9   :  { %v212_v35 = vld [vmem:[%s1366_s1 + $0x120] sm:$0xff]  ;;  %v213_v36 = vld [vmem:[%s1366_s1 + $0x128] sm:$0xff]  ;;  %v1081_v37 = vpack.c.bf16 %v181_v34, %v180_v32  ;;  %v230_v40 = vld [vmem:[%s1366_s1 + $0x1b0] sm:$0xff]  ;;  %v1096_v42 = vpack.c.bf16 %v199_v39, %v198_v38 }
   0xa   :  { %760 = vmatpush3.bf16.msra.mxu0 %v1043_v24  ;;  %v1094_v41 = vpack.c.bf16 %v213_v36, %v212_v35  ;;  %v231_v43 = vld [vmem:[%s1366_s1 + $0x1b8] sm:$0xff]  ;;  %v182_v44 = vld [vmem:[%s1366_s1 + $0x30] sm:$0xff]  ;;  %v200_v49 = vld [vmem:[%s1366_s1 + $0xc0] sm:$0xff]  ;;  %v1229_v36 = vshrl.u32 %v25_v3, 7 }
   0xb   :  { %792 = vmatpush3.bf16.msra.mxu1 %v1056_v28  ;;  %762 = vmatprep.subr.bf16.mxu0 %v1058_v29  ;;  %v183_v45 = vld [vmem:[%s1366_s1 + $0x38] sm:$0xff]  ;;  %v1108_v46 = vpack.c.bf16 %v231_v43, %v230_v40  ;;  %v214_v47 = vld [vmem:[%s1366_s1 + $0x130] sm:$0xff]  ;;  %v201_v50 = vld [vmem:[%s1366_s1 + $0xc8] sm:$0xff] }
   0xc   :  { %794 = vmatprep.subr.bf16.mxu1 %v1069_v33  ;;  %v215_v48 = vld [vmem:[%s1366_s1 + $0x138] sm:$0xff]  ;;  %v232_v51 = vld [vmem:[%s1366_s1 + $0x1c0] sm:$0xff]  ;;  %v233_v52 = vld [vmem:[%s1366_s1 + $0x1c8] sm:$0xff]  ;;  %v1129_v53 = vpack.c.bf16 %v183_v45, %v182_v44  ;;  %v1144_v58 = vpack.c.bf16 %v201_v50, %v200_v49 }
   0xd   :  { %v184_v54 = vld [vmem:[%s1366_s1 + $0x40] sm:$0xff]  ;;  %v185_v55 = vld [vmem:[%s1366_s1 + $0x48] sm:$0xff]  ;;  %v1142_v57 = vpack.c.bf16 %v215_v48, %v214_v47  ;;  %v202_v60 = vld [vmem:[%s1366_s1 + $0xd0] sm:$0xff]  ;;  %v1156_v62 = vpack.c.bf16 %v233_v52, %v232_v51 }
   0xe   :  { %764 = vmatpush3.bf16.msra.mxu0 %v1081_v37  ;;  %v216_v56 = vld [vmem:[%s1366_s1 + $0x140] sm:$0xff]  ;;  %v217_v59 = vld [vmem:[%s1366_s1 + $0x148] sm:$0xff]  ;;  %v203_v61 = vld [vmem:[%s1366_s1 + $0xd8] sm:$0xff]  ;;  %v1177_v7 = vpack.c.bf16 %v185_v55, %v184_v54  ;;  %v77_v54 = vunpack.c.0.s8 %v1203_v23 }
   0xf   :  { %796 = vmatpush3.bf16.msra.mxu1 %v1094_v41  ;;  %766 = vmatprep.subr.bf16.mxu0 %v1096_v42  ;;  %v234_v63 = vld [vmem:[%s1366_s1 + $0x1d0] sm:$0xff]  ;;  %v235_v0 = vld [vmem:[%s1366_s1 + $0x1d8] sm:$0xff]  ;;  %v204_v10 = vld [vmem:[%s1366_s1 + $0xe0] sm:$0xff]  ;;  %v1190_v15 = vpack.c.bf16 %v217_v59, %v216_v56  ;;  %v1192_v16 = vpack.c.bf16 %v203_v61, %v202_v60 }
  0x10   :  { %798 = vmatprep.subr.bf16.mxu1 %v1108_v46  ;;  %v186_v1 = vld [vmem:[%s1366_s1 + $0x50] sm:$0xff]  ;;  %v187_v2 = vld [vmem:[%s1366_s1 + $0x58] sm:$0xff]  ;;  %v205_v11 = vld [vmem:[%s1366_s1 + $0xe8] sm:$0xff]  ;;  %v1206_v25 = vpack.c.bf16 %v235_v0, %v234_v63 }
  0x11   :  { %v218_v5 = vld [vmem:[%s1366_s1 + $0x150] sm:$0xff]  ;;  %v219_v6 = vld [vmem:[%s1366_s1 + $0x158] sm:$0xff]  ;;  %v236_v12 = vld [vmem:[%s1366_s1 + $0x1e0] sm:$0xff]  ;;  %v1217_v31 = vpack.c.bf16 %v187_v2, %v186_v1  ;;  %v1234_v39 = vpack.c.bf16 %v205_v11, %v204_v10 }
  0x12   :  { %768 = vmatpush3.bf16.msra.mxu0 %v1129_v53  ;;  %v237_v17 = vld [vmem:[%s1366_s1 + $0x1e8] sm:$0xff]  ;;  %v188_v18 = vld [vmem:[%s1366_s1 + $0x60] sm:$0xff]  ;;  %v206_v30 = vld [vmem:[%s1366_s1 + $0xf0] sm:$0xff]  ;;  %v1232_v38 = vpack.c.bf16 %v219_v6, %v218_v5 }
  0x13   :  { %800 = vmatpush3.bf16.msra.mxu1 %v1142_v57  ;;  %770 = vmatprep.subr.bf16.mxu0 %v1144_v58  ;;  %v189_v21 = vld [vmem:[%s1366_s1 + $0x68] sm:$0xff]  ;;  %v220_v26 = vld [vmem:[%s1366_s1 + $0x160] sm:$0xff]  ;;  %v207_v32 = vld [vmem:[%s1366_s1 + $0xf8] sm:$0xff]  ;;  %v1236_v40 = vpack.c.bf16 %v237_v17, %v236_v12 }
  0x14   :  { %802 = vmatprep.subr.bf16.mxu1 %v1156_v62  ;;  %v221_v27 = vld [vmem:[%s1366_s1 + $0x168] sm:$0xff]  ;;  %v238_v34 = vld [vmem:[%s1366_s1 + $0x1f0] sm:$0xff]  ;;  %v239_v35 = vld [vmem:[%s1366_s1 + $0x1f8] sm:$0xff]  ;;  %v1238_v43 = vpack.c.bf16 %v189_v21, %v188_v18  ;;  %v1253_v48 = vpack.c.bf16 %v207_v32, %v206_v30 }
  0x15   :  { %v190_v44 = vld [vmem:[%s1366_s1 + $0x70] sm:$0xff]  ;;  %v191_v45 = vld [vmem:[%s1366_s1 + $0x78] sm:$0xff]  ;;  %v1251_v47 = vpack.c.bf16 %v221_v27, %v220_v26  ;;  %v1255_v49 = vpack.c.bf16 %v239_v35, %v238_v34  ;;  %v31_v51 = vld [vmem:[%s1365_s0] sm:$0xff] }
  0x16   :  { %772 = vmatpush3.bf16.msra.mxu0 %v1177_v7  ;;  %v222_v3 = vld [vmem:[%s1366_s1 + $0x170] sm:$0xff]  ;;  %v223_v50 = vld [vmem:[%s1366_s1 + $0x178] sm:$0xff]  ;;  %v32_v52 = vld [vmem:[%s1365_s0 + $0x8] sm:$0xff]  ;;  %v1268_v55 = vpack.c.bf16 %v191_v45, %v190_v44  ;;  %v36_v56 = vcombine.high %v31_v51, %v31_v51  ;;  %v41_v60 = vsel %vm40_vm1, %v31_v51, 0.0  ;;  %v105_v0 = vmul.f32 %v31_v51, %v31_v51 }
  0x17   :  { %804 = vmatpush3.bf16.msra.mxu1 %v1190_v15  ;;  %774 = vmatprep.subr.bf16.mxu0 %v1192_v16  ;;  %v37_v59 = vcombine.high %v32_v52, %v32_v52  ;;  %v42_v61 = vrot.slane %v41_v60, 4  ;;  %v55_v63 = vsel %vm40_vm1, %v32_v52, 0.0  ;;  %v106_v1 = vmul.f32 %v32_v52, %v32_v52 }
  0x18   :  { %806 = vmatprep.subr.bf16.mxu1 %v1206_v25 }
  0x19   :  { %12 = vsyncpa [#allocation7], 0  ;;  %v1273_v2 = vpack.c.bf16 %v223_v50, %v222_v3  ;;  %v48_v5 = vsel %vm40_vm1, %v36_v56, 0.0  ;;  %v56_v6 = vrot.slane %v55_v63, 4  ;;  %v62_v10 = vsel %vm40_vm1, %v37_v59, 0.0  ;;  %s941_s25 = smov [#allocation4]  }
  0x1a   :  { %776 = vmatpush3.bf16.msra.mxu0 %v1217_v31  ;;  %v43_v11 = vadd.f32 %v42_v61, %v41_v60  ;;  %v49_v12 = vrot.slane %v48_v5, 4  ;;  %v63_v17 = vrot.slane %v62_v10, 4  ;;  %v109_v18 = vcombine.high %v105_v0, %v105_v0  ;;  %s591_s26 = sshll.u32 %s941_s25, 4  ;;  %s942_s29 = smov [#allocation6]   ;;  %s592_s26 = int_to_ptr.vmem [resolvable:$true] %s591_s26 }
  0x1b   :  { %808 = vmatpush3.bf16.msra.mxu1 %v1232_v38  ;;  %778 = vmatprep.subr.bf16.mxu0 %v1234_v39  ;;  %v57_v21 = vadd.f32 %v56_v6, %v55_v63  ;;  %v110_v22 = vcombine.high %v106_v1, %v106_v1  ;;  %v113_v26 = vsel %vm40_vm1, %v105_v0, 0.0  ;;  %v127_v27 = vsel %vm40_vm1, %v106_v1, 0.0  ;;  %s601_s30 = sshll.u32 %s942_s29, 4  ;;  %s891_s6 = scalar_lea.vmem %s592_s26, 16  ;;  %s602_s30 = int_to_ptr.vmem [resolvable:$true] %s601_s30 }
  0x1c   :  { %810 = vmatprep.subr.bf16.mxu1 %v1236_v40  ;;  %v44_v30 = vrot.slane %v43_v11, 2  ;;  %v50_v32 = vadd.f32 %v49_v12, %v48_v5  ;;  %v64_v34 = vadd.f32 %v63_v17, %v62_v10  ;;  %v114_v35 = vrot.slane %v113_v26, 4  ;;  %p892_p0 = scmp.ne.s32.totalorder %s592_s26, %s891_s6  ;;  %s895_s7 = scalar_lea.vmem %s592_s26, 32 }
  0x1d   :  { %v58_v44 = vrot.slane %v57_v21, 2  ;;  %v120_v45 = vsel %vm40_vm1, %v109_v18, 0.0  ;;  %v128_v3 = vrot.slane %v127_v27, 4  ;;  %v134_v50 = vsel %vm40_vm1, %v110_v22, 0.0  ;;  %p896_p1 = scmp.lt.s32.totalorder %s592_s26, %s592_s26  ;;  %p897_p2 = scmp.lt.s32.totalorder %s895_s7, %s891_s6 }
  0x1e   :  { %780 = vmatpush3.bf16.msra.mxu0 %v1238_v43  ;;  %v45_v51 = vadd.f32 %v44_v30, %v43_v11  ;;  %v51_v52 = vrot.slane %v50_v32, 2  ;;  %v65_v56 = vrot.slane %v64_v34, 2  ;;  %v115_v59 = vadd.f32 %v114_v35, %v113_v26 }
  0x1f   :  { %812 = vmatpush3.bf16.msra.mxu1 %v1251_v47  ;;  %782 = vmatprep.subr.bf16.mxu0 %v1253_v48  ;;  %v59_v60 = vadd.f32 %v58_v44, %v57_v21  ;;  %v121_v61 = vrot.slane %v120_v45, 4  ;;  %v129_v63 = vadd.f32 %v128_v3, %v127_v27  ;;  %v135_v0 = vrot.slane %v134_v50, 4  ;;  %p898_p3 = por %p897_p2, %p896_p1 }
  0x20   :  { %814 = vmatprep.subr.bf16.mxu1 %v1255_v49  ;;  %v46_v1 = vrot.slane %v45_v51, 1  ;;  %v52_v5 = vadd.f32 %v51_v52, %v50_v32  ;;  %v66_v6 = vadd.f32 %v65_v56, %v64_v34  ;;  %v116_v10 = vrot.slane %v115_v59, 2 }
  0x21   :  { %v60_v12 = vrot.slane %v59_v60, 1  ;;  %v122_v17 = vadd.f32 %v121_v61, %v120_v45  ;;  %v130_v18 = vrot.slane %v129_v63, 2  ;;  %v136_v22 = vadd.f32 %v135_v0, %v134_v50  ;;  %p899_p4 = pnand %p898_p3, %p892_p0 }
  0x22   :  { %784 = vmatpush3.bf16.msra.mxu0 %v1268_v55  ;;  %v47_v11 = vadd.f32 %v46_v1, %v45_v51  ;;  %v53_v26 = vrot.slane %v52_v5, 1  ;;  %v67_v30 = vrot.slane %v66_v6, 1  ;;  %v117_v35 = vadd.f32 %v116_v10, %v115_v59 }
  0x23   :  { %816 = vmatpush3.bf16.msra.mxu1 %v1273_v2  ;;  %818 = vmatprep.subr.bf16.mxu0 %v982_v4  ;;  %v61_v21 = vadd.f32 %v60_v12, %v59_v60  ;;  %v123_v27 = vrot.slane %v122_v17, 2  ;;  %v131_v44 = vadd.f32 %v130_v18, %v129_v63  ;;  %v137_v32 = vrot.slane %v136_v22, 2 }
  0x24   :  { %850 = vmatprep.subr.bf16.mxu1 %v993_v8  ;;  %v54_v34 = vadd.f32 %v53_v26, %v52_v5  ;;  %v68_v3 = vadd.f32 %v67_v30, %v66_v6  ;;  %v80_v45 = vsub.s32 %v77_v54, %v1229_v36  ;;  %v118_v50 = vrot.slane %v117_v35, 1  ;;  %v33_v6 = vld [vmem:[#allocation2] sm:$0xf] }
  0x25   :  { %v124_v52 = vadd.f32 %v123_v27, %v122_v17  ;;  %v132_v51 = vrot.slane %v131_v44, 1  ;;  %v138_v56 = vadd.f32 %v137_v32, %v136_v22  ;;  %v104_v22 = vld [vmem:[#allocation3] sm:$0xf]  ;;  %v243_v32 = vsub.s32 0, %v1229_v36 }
  0x26   :  { %v73_v61 = vcombine.low %v47_v11, %v54_v34  ;;  %v74_v59 = vcombine.low %v61_v21, %v68_v3  ;;  %v119_v0 = vadd.f32 %v118_v50, %v117_v35  ;;  %v247_v21 = vsub.s32 1, %v1229_v36 }
  0x27   :  { %v125_v4 = vrot.slane %v124_v52, 1  ;;  %v133_v60 = vadd.f32 %v132_v51, %v131_v44  ;;  %v139_v1 = vrot.slane %v138_v56, 1  ;;  %v255_v44 = vsub.s32 3, %v1229_v36 }
  0x28   :  { %v81_v63 = vrot.slane %v73_v61, %v80_v45  ;;  %v88_v10 = vrot.slane %v74_v59, %v80_v45  ;;  %v251_v34 = vsub.s32 2, %v1229_v36  ;;  %vm579_vm4 = vcmask 24576   ;;  %v581_v61 = vld [vmem:[%s1368_s3] sm:$0x1] }
  0x29   :  { %v126_v12 = vadd.f32 %v125_v4, %v124_v52  ;;  %v140_v8 = vadd.f32 %v139_v1, %v138_v56 }
  0x2a   :  { %v89_v5 = vcombine.low %v81_v63, %v88_v10 }
  0x2b   :  { %v145_v18 = vcombine.low %v119_v0, %v126_v12  ;;  %v146_v26 = vcombine.low %v133_v60, %v140_v8 }
  0x2c   :  { %v96_v23 = vrot.slane %v89_v5, %v80_v45 }
  0x2d   :  { %v153_v54 = vrot.slane %v145_v18, %v80_v45  ;;  %v160_v30 = vrot.slane %v146_v26, %v80_v45 }
  0x2e   :  { %v98_v17 = vadd.f32 %v96_v23, %v33_v6 }
  0x2f   :  { %v161_v27 = vcombine.low %v153_v54, %v160_v30 }
  0x30   :  { %103 = vst.msk [vmem:[#allocation2] sm:$0xf] %vm1007_vm0, %v98_v17 }
  0x31   :  { %v168_v11 = vrot.slane %v161_v27, %v80_v45 }
  0x33   :  { %v170_v35 = vadd.f32 %v168_v11, %v104_v22 }
  0x35   :  { %171 = vst.msk [vmem:[#allocation3] sm:$0xf] %vm1007_vm0, %v170_v35 }
  0x37   :  { %v175_v3 = vld [vmem:[#allocation2] sm:$0xf] }
  0x38   :  { %v248_v50 = vrot.slane %v175_v3, %v247_v21  ;;  %v256_v52 = vrot.slane %v175_v3, %v255_v44  ;;  %v244_v51 = vrot.slane %v175_v3, %v243_v32  ;;  %v252_v56 = vrot.slane %v175_v3, %v251_v34 }
  0x3a   :  { %325 = vmatprep.mubr.f32.mxu0 %v248_v50  ;;  %395 = vmatprep.mubr.f32.mxu1 %v256_v52 }
  0x3b   :  { %326 = vmatmul.mubr.f32.vlgmr.msra.gmra.mrb[0].mxu0 %v244_v51  ;;  %396 = vmatmul.mubr.f32.vlgmr.msra.gmra.mrb[0].mxu1 %v252_v56 }
  0x3c   :  { %820 = vmatpush3.bf16.msra.mxu0 %v995_v9  ;;  %852 = vmatpush3.bf16.msra.mxu1 %v1012_v14  ;;  %v401_v45 = vld [vmem:[#allocation3] sm:$0xf] }
  0x3d   :  { %822 = vmatprep.subr.bf16.mxu0 %v1029_v19  ;;  %854 = vmatprep.subr.bf16.mxu1 %v1031_v20  ;;  %v410_v13 = vrot.slane %v401_v45, %v247_v21  ;;  %v418_v36 = vrot.slane %v401_v45, %v255_v44  ;;  %v406_v9 = vrot.slane %v401_v45, %v243_v32 }
  0x3e   :  { %v414_v14 = vrot.slane %v401_v45, %v251_v34 }
  0x3f   :  { %487 = vmatprep.mubr.f32.mxu0 %v410_v13  ;;  %557 = vmatprep.mubr.f32.mxu1 %v418_v36 }
  0x40   :  { %824 = vmatpush3.bf16.msra.mxu0 %v1043_v24  ;;  %856 = vmatpush3.bf16.msra.mxu1 %v1056_v28 }
  0x41   :  { %826 = vmatprep.subr.bf16.mxu0 %v1058_v29  ;;  %858 = vmatprep.subr.bf16.mxu1 %v1069_v33 }
  0x44   :  { %828 = vmatpush3.bf16.msra.mxu0 %v1081_v37  ;;  %860 = vmatpush3.bf16.msra.mxu1 %v1094_v41 }
  0x45   :  { %830 = vmatprep.subr.bf16.mxu0 %v1096_v42  ;;  %862 = vmatprep.subr.bf16.mxu1 %v1108_v46 }
  0x48   :  { %832 = vmatpush3.bf16.msra.mxu0 %v1129_v53  ;;  %864 = vmatpush3.bf16.msra.mxu1 %v1142_v57 }
  0x49   :  { %834 = vmatprep.subr.bf16.mxu0 %v1144_v58  ;;  %866 = vmatprep.subr.bf16.mxu1 %v1156_v62 }
  0x4c   :  { %836 = vmatpush3.bf16.msra.mxu0 %v1177_v7  ;;  %868 = vmatpush3.bf16.msra.mxu1 %v1190_v15 }
  0x4d   :  { %838 = vmatprep.subr.bf16.mxu0 %v1192_v16  ;;  %870 = vmatprep.subr.bf16.mxu1 %v1206_v25 }
  0x50   :  { %840 = vmatpush3.bf16.msra.mxu0 %v1217_v31  ;;  %872 = vmatpush3.bf16.msra.mxu1 %v1232_v38 }
  0x51   :  { %842 = vmatprep.subr.bf16.mxu0 %v1234_v39  ;;  %874 = vmatprep.subr.bf16.mxu1 %v1236_v40 }
  0x54   :  { %844 = vmatpush3.bf16.msra.mxu0 %v1238_v43  ;;  %876 = vmatpush3.bf16.msra.mxu1 %v1251_v47 }
  0x55   :  { %846 = vmatprep.subr.bf16.mxu0 %v1253_v48  ;;  %878 = vmatprep.subr.bf16.mxu1 %v1255_v49  ;;  %v568_v49 = vld [vmem:[%s1367_s2] sm:$0x1] }
  0x58   :  { %848 = vmatpush3.bf16.msra.mxu0 %v1268_v55  ;;  %880 = vmatpush3.bf16.msra.mxu1 %v1273_v2 }
  0x5b   :  { %488 = vmatmul.mubr.f32.vlgmr.msra.gmra.mrb[2].mxu0 %v406_v9  ;;  %558 = vmatmul.mubr.f32.vlgmr.msra.gmra.mrb[2].mxu1 %v414_v14 }
 0x10e   :  { %v645_v19 = vpop.f32.mrb[0].mxu0  ;;  %v680_v20 = vpop.f32.mrb[0].mxu1 }
 0x10f   :  { %v646_v24 = vpop.f32.mrb[1].mxu0  ;;  %v681_v28 = vpop.f32.mrb[1].mxu1 }
 0x110   :  { %v647_v29 = vadd.f32 %v646_v24, %v645_v19  ;;  %v682_v33 = vadd.f32 %v681_v28, %v680_v20 }
 0x112   :  { %v398_v37 = vadd.f32 %v682_v33, %v647_v29 }
 0x114   :  { %v563_v57 = vmul.f32 0.001953125, %v398_v37 }
 0x116   :  { %v565_v15 = vmul.f32 %v563_v57, %v563_v57 }
 0x12e   :  { %v715_v41 = vpop.f32.mrb[2].mxu0  ;;  %v750_v42 = vpop.f32.mrb[2].mxu1 }
 0x12f   :  { %v716_v46 = vpop.f32.mrb[3].mxu0  ;;  %v751_v53 = vpop.f32.mrb[3].mxu1 }
 0x130   :  { %v717_v58 = vadd.f32 %v716_v46, %v715_v41  ;;  %v752_v62 = vadd.f32 %v751_v53, %v750_v42 }
 0x132   :  { %v560_v7 = vadd.f32 %v752_v62, %v717_v58 }
 0x134   :  { %v564_v16 = vmul.f32 0.001953125, %v560_v7 }
 0x136   :  { %v566_v25 = vsub.f32 %v564_v16, %v565_v15 }
 0x138   :  { %v567_v31 = vmax.f32 %v566_v25, 0.0 }
 0x13a   :  { %v569_v38 = vadd.f32 1e-05, %v567_v31 }
 0x13c   :  { %887 = vrsqrt.f32 %v569_v38  ;;  %vm572_vm2 = vcmp.eq.f32.partialorder %v569_v38, inf  ;;  %v575_v43 = vand.u32 2147483648, %v569_v38  ;;  %vm574_vm3 = vcmp.eq.f32.partialorder %v569_v38, 0.0 }
 0x146   :  { %v888_v39 = vpop.eup %887 }
 0x147   :  { %v571_v40 = vmul.f32 %v888_v39, %v569_v38 }
 0x149   :  { %v573_v47 = vsel %vm572_vm2, %v569_v38, %v571_v40 }
 0x14a   :  { %v576_v48 = vsel %vm574_vm3, %v575_v43, %v573_v47 }
 0x14b   :  { %889 = vrcp.f32 %v576_v48 }
 0x155   :  { %v890_v55 = vpop.eup %889 }
 0x156   :  { %v578_v2 = vmul.f32 %v890_v55, %v568_v49 }
 0x158   :  { %580 = vst.msk [vmem:[#allocation4] sm:$0x1] %vm579_vm4, %v578_v2  ;;  %v582_v59 = vmul.f32 %v578_v2, %v563_v57 }
 0x159   :  { %902 = shalt.err (!%p899_p4)
}
 0x15a   :  { %s903_s9 = scalar_lea.hbm %s1369_s4, 16 }
 0x15b   :  { %p904_p5 = scmp.ne.s32.totalorder %s1369_s4, %s903_s9  ;;  %p907_p6 = scmp.lt.u32.totalorder %s903_s9, %s1369_s4 }
 0x15d   :  { %p909_p7 = pnand %p907_p6, %p904_p5 }
 0x15f   :  { %912 = shalt.err (!%p909_p7)
}
 0x160   :  { %594 = dma.vmem_to_hbm [thread:$0]  %s592_s26, 16, %s1369_s4, [#allocation5]   ;;  %v583_v0 = vsub.f32 %v581_v61, %v582_v59 }
 0x161   :  { %s913_s15 = scalar_lea.vmem %s602_s30, 16  ;;  %s917_s16 = scalar_lea.vmem %s602_s30, 32 }
 0x162   :  { %584 = vst.msk [vmem:[#allocation6] sm:$0x1] %vm579_vm4, %v583_v0  ;;  %p914_p8 = scmp.ne.s32.totalorder %s602_s30, %s913_s15  ;;  %p918_p9 = scmp.lt.s32.totalorder %s602_s30, %s602_s30 }
 0x163   :  { %p919_p10 = scmp.lt.s32.totalorder %s917_s16, %s913_s15 }
 0x165   :  { %p920_p11 = por %p919_p10, %p918_p9 }
 0x167   :  { %p921_p12 = pnand %p920_p11, %p914_p8 }
 0x169   :  { %924 = shalt.err (!%p921_p12)
}
 0x16a   :  { %s925_s19 = scalar_lea.hbm %s1370_s5, 16 }
 0x16b   :  { %p926_p13 = scmp.ne.s32.totalorder %s1370_s5, %s925_s19  ;;  %p929_p0 = scmp.lt.u32.totalorder %s925_s19, %s1370_s5 }
 0x16d   :  { %p931_p1 = pnand %p929_p0, %p926_p13 }
 0x16f   :  { %934 = shalt.err (!%p931_p1)
}
 0x170   :  { %604 = dma.vmem_to_hbm [thread:$0]  %s602_s30, 16, %s1370_s5, [#allocation7]  }
 0x171   :  { %935 = dma.done.wait [#allocation5], 16  }
 0x172   :  { %936 = vsyncadd [#allocation5], 4294967280 }
 0x173   :  { %937 = dma.done.wait [#allocation7], 16  }
 0x174   :  { %938 = vsyncadd [#allocation7], 4294967280 }
 0x175   :  { %611 = vsyncpa [#allocation5], 1 }
 0x176   :  { %612 = vsyncpa [#allocation7], 1 }

</bundles_post_ra>
